<compile_context>
chip_gen: v7x
topology: tpu7x:2x2x1
jax: 0.10.0
libtpu: 0.0.40
codegen_flags: <defaults>
</compile_context>

<pallas_src>
import math

import jax
import jax.numpy as jnp
from jax.experimental import pallas as pl
from jax.experimental.pallas import tpu as pltpu


def _regression3_kernel(x_ref, w1_ref, aux_ref, b2_ref, o_ref):
    # h = relu(x @ W1 + b1)   : (Bp, size1)bf16 @ (size1, size2)bf16 -> f32 acc
    h = jnp.dot(x_ref[...], w1_ref[...], preferred_element_type=jnp.float32)
    h = jnp.maximum(h + aux_ref[0:1, :], 0.0)        # b1 broadcasts over rows
    # Second linear has a single output column: do it on the VPU/XLU instead of
    # the MXU.  z = h @ w2 + b2  ==  sum(h * w2_row, axis=-1) + b2
    z = jnp.sum(h * aux_ref[1:2, :], axis=-1, keepdims=True) + b2_ref[0, 0]
    o_ref[...] = jax.nn.sigmoid(z).astype(o_ref.dtype)


@jax.jit
def regression3_forward(x_nchw, w1, b1, w2, b2):
    """x_nchw: (B, C, H, W) float32. Returns (B, 1) float32 in [0, 1]."""
    b = x_nchw.shape[0]
    x2d = x_nchw.reshape(b, -1)              # matches torch's x.view(B, -1)
    size1 = x2d.shape[1]
    size2 = w1.shape[1]

    # Pad batch up to a sublane multiple (8) so the x / output blocks are
    # aligned; padded rows are sliced off at the end.
    b_pad = max(8, ((b + 7) // 8) * 8)
    if b_pad != b:
        x2d = jnp.pad(x2d, ((0, b_pad - b), (0, 0)))

    # bf16 streaming of the big operands, f32 accumulation on the MXU.
    x_bf = x2d.astype(jnp.bfloat16)
    w1_bf = w1.astype(jnp.bfloat16)

    # Pack b1 and the w2 column into one (2, size2) f32 array: one DMA, not two.
    aux = jnp.stack(
        [b1.astype(jnp.float32), w2.reshape(size2).astype(jnp.float32)], axis=0)
    b2_sc = b2.reshape(1, 1).astype(jnp.float32)

    # Everything fits comfortably in VMEM, so full-array blocks, no grid.
    full = lambda shape: pl.BlockSpec(shape, lambda: tuple(0 for _ in shape))

    out = pl.pallas_call(
        _regression3_kernel,
        out_shape=jax.ShapeDtypeStruct((b_pad, 1), jnp.float32),
        in_specs=[
            full((b_pad, size1)),                               # x (bf16)
            full((size1, size2)),                               # W1 (bf16)
            full((2, size2)),                                   # [b1; w2] (f32)
            pl.BlockSpec(memory_space=pltpu.MemorySpace.SMEM),  # b2 scalar
        ],
        out_specs=full((b_pad, 1)),
    )(x_bf, w1_bf, aux, b2_sc)
    return out[:b]


def init_params(key, size1, size2):
    """Deterministic init mimicking nn.Linear's U(-1/sqrt(fan_in), 1/sqrt(fan_in))."""
    k1, k2, k3, k4 = jax.random.split(key, 4)
    lim1 = 1.0 / math.sqrt(size1)
    lim2 = 1.0 / math.sqrt(size2)
    w1 = jax.random.uniform(k1, (size1, size2), jnp.float32, -lim1, lim1)
    b1 = jax.random.uniform(k2, (size2,), jnp.float32, -lim1, lim1)
    w2 = jax.random.uniform(k3, (size2, 1), jnp.float32, -lim2, lim2)
    b2 = jax.random.uniform(k4, (1,), jnp.float32, -lim2, lim2)
    return w1, b1, w2, b2


if __name__ == "__main__":
    key = jax.random.PRNGKey(0)
    kx, kp = jax.random.split(key)

    # Small shapes consistent with the module: x (B, C, H, W) -> size1 = C*H*W
    B, C, H, W = 2, 4, 16, 16
    size1 = C * H * W            # 1024
    size2 = 256

    x = jax.random.normal(kx, (B, C, H, W), jnp.float32)
    w1, b1, w2, b2 = init_params(kp, size1, size2)

    out = regression3_forward(x, w1, b1, w2, b2)
    out = jax.block_until_ready(out)
    assert out.shape == (B, 1)

    # Reference with the same bf16 quantization of x/W1 (f32 accumulation).
    x2d = x.reshape(B, -1)
    h_ref = jnp.maximum(
        jnp.dot(x2d.astype(jnp.bfloat16), w1.astype(jnp.bfloat16),
                preferred_element_type=jnp.float32) + b1, 0.0)
    ref = jax.nn.sigmoid(
        jnp.sum(h_ref * w2.reshape(1, size2), axis=-1, keepdims=True) + b2)
    assert jnp.allclose(out, ref, atol=1e-4, rtol=1e-4), \
        float(jnp.max(jnp.abs(out - ref)))

    # Sanity: close to the full-f32 module forward (bf16 quant error is tiny).
    ref_f32 = jax.nn.sigmoid(jnp.maximum(x2d @ w1 + b1, 0.0) @ w2 + b2)
    assert jnp.allclose(out, ref_f32, atol=5e-2), \
        float(jnp.max(jnp.abs(out - ref_f32)))

    print("KERNEL_OK")
</pallas_src>

<mosaic_0001>
module attributes {stable_mosaic.version = 11 : i64} {
  func.func @_regression3_kernel(%arg0: memref<8x1024xbf16, #tpu.memory_space<vmem>>, %arg1: memref<1024x256xbf16, #tpu.memory_space<vmem>>, %arg2: memref<2x256xf32, #tpu.memory_space<vmem>>, %arg3: memref<1x1xf32, #tpu.memory_space<smem>>, %arg4: memref<8x1xf32, #tpu.memory_space<vmem>>) attributes {dimension_semantics = [], scalar_prefetch = 0 : i64, scratch_operands = 0 : i64, tpu.core_type = #tpu.core_type<tc>} {
    %c0 = arith.constant 0 : index
    %c0_0 = arith.constant 0 : index
    %0 = vector.load %arg0[%c0, %c0_0] : memref<8x1024xbf16, #tpu.memory_space<vmem>>, vector<8x1024xbf16>
    %c0_1 = arith.constant 0 : index
    %c0_2 = arith.constant 0 : index
    %1 = vector.load %arg1[%c0_1, %c0_2] : memref<1024x256xbf16, #tpu.memory_space<vmem>>, vector<1024x256xbf16>
    %cst = arith.constant dense<0.000000e+00> : vector<8x256xf32>
    %2 = tpu.matmul %0, %1, %cst {dimension_numbers = #tpu.dot_dimension_numbers<[1], [0], [0], [1], [0, 0, 1, 1], [], []>} : vector<8x1024xbf16>, vector<1024x256xbf16>, vector<8x256xf32> -> vector<8x256xf32>
    %c0_3 = arith.constant 0 : index
    %c0_4 = arith.constant 0 : index
    %3 = vector.load %arg2[%c0_3, %c0_4] : memref<2x256xf32, #tpu.memory_space<vmem>>, vector<1x256xf32>
    %4 = vector.broadcast %3 : vector<1x256xf32> to vector<8x256xf32>
    %5 = arith.addf %2, %4 : vector<8x256xf32>
    %cst_5 = arith.constant 0.000000e+00 : f32
    %6 = vector.broadcast %cst_5 : f32 to vector<8x256xf32>
    %7 = arith.maximumf %5, %6 : vector<8x256xf32>
    %c1 = arith.constant 1 : index
    %c0_6 = arith.constant 0 : index
    %8 = vector.load %arg2[%c1, %c0_6] : memref<2x256xf32, #tpu.memory_space<vmem>>, vector<1x256xf32>
    %9 = vector.broadcast %8 : vector<1x256xf32> to vector<8x256xf32>
    %10 = arith.mulf %7, %9 : vector<8x256xf32>
    %cst_7 = arith.constant dense<0.000000e+00> : vector<8xf32>
    %11 = vector.multi_reduction <add>, %10, %cst_7 [1] : vector<8x256xf32> to vector<8xf32>
    %12 = vector.shape_cast %11 : vector<8xf32> to vector<8x1xf32>
    %c0_8 = arith.constant 0 : index
    %c0_9 = arith.constant 0 : index
    %13 = memref.load %arg3[%c0_8, %c0_9] : memref<1x1xf32, #tpu.memory_space<smem>>
    %14 = vector.broadcast %13 : f32 to vector<8x1xf32>
    %15 = arith.addf %12, %14 : vector<8x1xf32>
    %16 = arith.negf %15 : vector<8x1xf32>
    %17 = math.exp %16 : vector<8x1xf32>
    %cst_10 = arith.constant 1.000000e+00 : f32
    %18 = vector.broadcast %cst_10 : f32 to vector<8x1xf32>
    %19 = arith.addf %18, %17 : vector<8x1xf32>
    %20 = arith.divf %18, %19 : vector<8x1xf32>
    %c0_11 = arith.constant 0 : index
    %c0_12 = arith.constant 0 : index
    %21 = vector.load %arg4[%c0_11, %c0_12] : memref<8x1xf32, #tpu.memory_space<vmem>>, vector<8x1xf32>
    tpu.vector_store %arg4[%c0_11, %c0_12], %20 {strides = array<i32>} : memref<8x1xf32, #tpu.memory_space<vmem>>, vector<8x1xf32>,
    return
  }
}

</mosaic_0001>

<bundles_post_ra>
// kernel: regression3_forward.1
= control target key start
LH: loop header
LB: loop body
LE: loop exit
PB: predicated region body
PF: predicated region fallthrough
CT: control target
= control target key end

     0   :  { %vm1023_vm0 = vcmask 7168   ;;  %s1828_s1 = inlined_call_operand.vmem [shape: bf16[1024,256], index: 1, kind: input, shape index: {}]   ;;  %s1829_s0 = inlined_call_operand.vmem [shape: bf16[8,1024], index: 0, kind: input, shape index: {}]   ;;  %s1830_s2 = inlined_call_operand.vmem [shape: f32[2,256], index: 2, kind: input, shape index: {}]   ;;  %s1831_s3 = inlined_call_operand.<no memory space> [shape: f32[1,1], index: 3, kind: input, shape index: {}]   ;;  %s1832_s4 = inlined_call_operand.vmem [shape: f32[8,1], index: 4, kind: output, shape index: {}]  }
   0x1   :  { %v1179_v0 = vld [vmem:[%s1828_s1 + $0x4] ss:$8 sps:$4 sm:$0xff]   ;;  %v1183_v2 = vld [vmem:[%s1828_s1] ss:$8 sps:$4 sm:$0xff]   ;;  %v1185_v4 = vld [vmem:[%s1828_s1 + $0x14] ss:$8 sps:$4 sm:$0xff]  }
   0x2   :  { %v1181_v1 = vld [vmem:[%s1828_s1 + $0x204] ss:$8 sps:$4 sm:$0xff]   ;;  %830 = vmatprep.subr.bf16.mxu1 %v1179_v0  ;;  %v1184_v3 = vld [vmem:[%s1828_s1 + $0x200] ss:$8 sps:$4 sm:$0xff]   ;;  %v1187_v5 = vld [vmem:[%s1828_s1 + $0x214] ss:$8 sps:$4 sm:$0xff]  }
   0x3   :  { %912 = vmatprep.subr.bf16.mxu0 %v1181_v1  ;;  %831 = vmatpush1.bf16.msra.mxu1 %v1183_v2  ;;  %v1189_v6 = vld [vmem:[%s1828_s1 + $0x10] ss:$8 sps:$4 sm:$0xff]   ;;  %v1191_v8 = vld [vmem:[%s1828_s1 + $0x24] ss:$8 sps:$4 sm:$0xff]   ;;  %v1195_v10 = vld [vmem:[%s1828_s1 + $0x20] ss:$8 sps:$4 sm:$0xff]  }
   0x4   :  { %913 = vmatpush1.bf16.msra.mxu0 %v1184_v3  ;;  %832 = vmatprep.subr.bf16.mxu1 %v1185_v4  ;;  %v1190_v7 = vld [vmem:[%s1828_s1 + $0x210] ss:$8 sps:$4 sm:$0xff]   ;;  %v1193_v9 = vld [vmem:[%s1828_s1 + $0x224] ss:$8 sps:$4 sm:$0xff]   ;;  %v1196_v11 = vld [vmem:[%s1828_s1 + $0x220] ss:$8 sps:$4 sm:$0xff]  }
   0x5   :  { %914 = vmatprep.subr.bf16.mxu0 %v1187_v5  ;;  %v1197_v12 = vld [vmem:[%s1828_s1 + $0x34] ss:$8 sps:$4 sm:$0xff]   ;;  %v1201_v14 = vld [vmem:[%s1828_s1 + $0x30] ss:$8 sps:$4 sm:$0xff]   ;;  %v1203_v16 = vld [vmem:[%s1828_s1 + $0x44] ss:$8 sps:$4 sm:$0xff]  }
   0x6   :  { %v1199_v13 = vld [vmem:[%s1828_s1 + $0x234] ss:$8 sps:$4 sm:$0xff]   ;;  %v1202_v15 = vld [vmem:[%s1828_s1 + $0x230] ss:$8 sps:$4 sm:$0xff]   ;;  %v1205_v17 = vld [vmem:[%s1828_s1 + $0x244] ss:$8 sps:$4 sm:$0xff]  }
   0x7   :  { %833 = vmatpush1.bf16.msra.mxu1 %v1189_v6  ;;  %v1207_v18 = vld [vmem:[%s1828_s1 + $0x40] ss:$8 sps:$4 sm:$0xff]   ;;  %v1209_v20 = vld [vmem:[%s1828_s1 + $0x54] ss:$8 sps:$4 sm:$0xff]   ;;  %v1213_v22 = vld [vmem:[%s1828_s1 + $0x50] ss:$8 sps:$4 sm:$0xff]  }
   0x8   :  { %915 = vmatpush1.bf16.msra.mxu0 %v1190_v7  ;;  %834 = vmatprep.subr.bf16.mxu1 %v1191_v8  ;;  %v1208_v19 = vld [vmem:[%s1828_s1 + $0x240] ss:$8 sps:$4 sm:$0xff]   ;;  %v1211_v21 = vld [vmem:[%s1828_s1 + $0x254] ss:$8 sps:$4 sm:$0xff]   ;;  %v1214_v23 = vld [vmem:[%s1828_s1 + $0x250] ss:$8 sps:$4 sm:$0xff]  }
   0x9   :  { %916 = vmatprep.subr.bf16.mxu0 %v1193_v9  ;;  %v1215_v24 = vld [vmem:[%s1828_s1 + $0x64] ss:$8 sps:$4 sm:$0xff]   ;;  %v1219_v26 = vld [vmem:[%s1828_s1 + $0x60] ss:$8 sps:$4 sm:$0xff]   ;;  %v1221_v28 = vld [vmem:[%s1828_s1 + $0x74] ss:$8 sps:$4 sm:$0xff]  }
   0xa   :  { %v1217_v25 = vld [vmem:[%s1828_s1 + $0x264] ss:$8 sps:$4 sm:$0xff]   ;;  %v1220_v27 = vld [vmem:[%s1828_s1 + $0x260] ss:$8 sps:$4 sm:$0xff]   ;;  %v1223_v29 = vld [vmem:[%s1828_s1 + $0x274] ss:$8 sps:$4 sm:$0xff]  }
   0xb   :  { %835 = vmatpush1.bf16.msra.mxu1 %v1195_v10  ;;  %v1225_v30 = vld [vmem:[%s1828_s1 + $0x70] ss:$8 sps:$4 sm:$0xff]   ;;  %v1227_v32 = vld [vmem:[%s1828_s1 + $0x84] ss:$8 sps:$4 sm:$0xff]   ;;  %v1231_v34 = vld [vmem:[%s1828_s1 + $0x80] ss:$8 sps:$4 sm:$0xff]  }
   0xc   :  { %917 = vmatpush1.bf16.msra.mxu0 %v1196_v11  ;;  %836 = vmatprep.subr.bf16.mxu1 %v1197_v12  ;;  %v1226_v31 = vld [vmem:[%s1828_s1 + $0x270] ss:$8 sps:$4 sm:$0xff]   ;;  %v1229_v33 = vld [vmem:[%s1828_s1 + $0x284] ss:$8 sps:$4 sm:$0xff]   ;;  %v1232_v35 = vld [vmem:[%s1828_s1 + $0x280] ss:$8 sps:$4 sm:$0xff]  }
   0xd   :  { %918 = vmatprep.subr.bf16.mxu0 %v1199_v13  ;;  %v1233_v36 = vld [vmem:[%s1828_s1 + $0x94] ss:$8 sps:$4 sm:$0xff]   ;;  %v1237_v38 = vld [vmem:[%s1828_s1 + $0x90] ss:$8 sps:$4 sm:$0xff]   ;;  %v1239_v40 = vld [vmem:[%s1828_s1 + $0xa4] ss:$8 sps:$4 sm:$0xff]  }
   0xe   :  { %v1235_v37 = vld [vmem:[%s1828_s1 + $0x294] ss:$8 sps:$4 sm:$0xff]   ;;  %v1238_v39 = vld [vmem:[%s1828_s1 + $0x290] ss:$8 sps:$4 sm:$0xff]   ;;  %v1241_v41 = vld [vmem:[%s1828_s1 + $0x2a4] ss:$8 sps:$4 sm:$0xff]  }
   0xf   :  { %837 = vmatpush1.bf16.msra.mxu1 %v1201_v14  ;;  %v1243_v42 = vld [vmem:[%s1828_s1 + $0xa0] ss:$8 sps:$4 sm:$0xff]   ;;  %v1245_v44 = vld [vmem:[%s1828_s1 + $0xb4] ss:$8 sps:$4 sm:$0xff]   ;;  %v1249_v47 = vld [vmem:[%s1828_s1 + $0xb0] ss:$8 sps:$4 sm:$0xff]  }
  0x10   :  { %919 = vmatpush1.bf16.msra.mxu0 %v1202_v15  ;;  %838 = vmatprep.subr.bf16.mxu1 %v1203_v16  ;;  %v1244_v43 = vld [vmem:[%s1828_s1 + $0x2a0] ss:$8 sps:$4 sm:$0xff]   ;;  %v1247_v45 = vld [vmem:[%s1828_s1 + $0x2b4] ss:$8 sps:$4 sm:$0xff]   ;;  %v1250_v49 = vld [vmem:[%s1828_s1 + $0x2b0] ss:$8 sps:$4 sm:$0xff]  }
  0x11   :  { %920 = vmatprep.subr.bf16.mxu0 %v1205_v17  ;;  %v18_v46 = vld [vmem:[%s1829_s0] sm:$0xff]  ;;  %v20_v50 = vld [vmem:[%s1829_s0 + $0x10] sm:$0xff] }
  0x12   :  { %v1030_v48 = vcombine.high %v18_v46, %v18_v46  ;;  %v1251_v51 = vld [vmem:[%s1828_s1 + $0xc4] ss:$8 sps:$4 sm:$0xff]   ;;  %v1034_v53 = vcombine.high %v20_v50, %v20_v50  ;;  %v1255_v54 = vld [vmem:[%s1828_s1 + $0xc0] ss:$8 sps:$4 sm:$0xff]   ;;  %v1257_v56 = vld [vmem:[%s1828_s1 + $0xd4] ss:$8 sps:$4 sm:$0xff]   ;;  %v1029_v6 = vcombine.low %v18_v46, %v18_v46  ;;  %v1033_v7 = vcombine.low %v20_v50, %v20_v50 }
  0x13   :  { %839 = vmatpush1.bf16.msra.mxu1 %v1207_v18  ;;  %v1253_v52 = vld [vmem:[%s1828_s1 + $0x2c4] ss:$8 sps:$4 sm:$0xff]   ;;  %v1256_v55 = vld [vmem:[%s1828_s1 + $0x2c0] ss:$8 sps:$4 sm:$0xff]   ;;  %v1259_v57 = vld [vmem:[%s1828_s1 + $0x2d4] ss:$8 sps:$4 sm:$0xff]  }
  0x14   :  { %921 = vmatpush1.bf16.msra.mxu0 %v1208_v19  ;;  %840 = vmatprep.subr.bf16.mxu1 %v1209_v20  ;;  %v1261_v58 = vld [vmem:[%s1828_s1 + $0xd0] ss:$8 sps:$4 sm:$0xff]   ;;  %v1263_v60 = vld [vmem:[%s1828_s1 + $0xe4] ss:$8 sps:$4 sm:$0xff]   ;;  %v1267_v62 = vld [vmem:[%s1828_s1 + $0xe0] ss:$8 sps:$4 sm:$0xff]  }
  0x15   :  { %922 = vmatprep.subr.bf16.mxu0 %v1211_v21  ;;  %862 = vmatprep.mubr.bf16.mxu1 %v1030_v48  ;;  %v1262_v59 = vld [vmem:[%s1828_s1 + $0x2d0] ss:$8 sps:$4 sm:$0xff]   ;;  %v1265_v61 = vld [vmem:[%s1828_s1 + $0x2e4] ss:$8 sps:$4 sm:$0xff]   ;;  %v1268_v63 = vld [vmem:[%s1828_s1 + $0x2e0] ss:$8 sps:$4 sm:$0xff]  }
  0x16   :  { %944 = vmatprep.mubr.bf16.mxu0 %v1034_v53  ;;  %v1269_v0 = vld [vmem:[%s1828_s1 + $0xf4] ss:$8 sps:$4 sm:$0xff]   ;;  %v1273_v2 = vld [vmem:[%s1828_s1 + $0xf0] ss:$8 sps:$4 sm:$0xff]   ;;  %v1279_v4 = vld [vmem:[%s1828_s1 + $0x104] ss:$8 sps:$4 sm:$0xff]  }
  0x17   :  { %841 = vmatpush1.bf16.msra.mxu1 %v1213_v22  ;;  %v1271_v1 = vld [vmem:[%s1828_s1 + $0x2f4] ss:$8 sps:$4 sm:$0xff]   ;;  %v1274_v3 = vld [vmem:[%s1828_s1 + $0x2f0] ss:$8 sps:$4 sm:$0xff]   ;;  %v1284_v5 = vld [vmem:[%s1828_s1 + $0x304] ss:$8 sps:$4 sm:$0xff]  }
  0x18   :  { %923 = vmatpush1.bf16.msra.mxu0 %v1214_v23  ;;  %842 = vmatprep.subr.bf16.mxu1 %v1215_v24  ;;  %v1277_v8 = vld [vmem:[%s1828_s1 + $0x100] ss:$8 sps:$4 sm:$0xff]   ;;  %v1287_v10 = vld [vmem:[%s1828_s1 + $0x114] ss:$8 sps:$4 sm:$0xff]   ;;  %v1285_v12 = vld [vmem:[%s1828_s1 + $0x110] ss:$8 sps:$4 sm:$0xff]  }
  0x19   :  { %924 = vmatprep.subr.bf16.mxu0 %v1217_v25  ;;  %v1282_v9 = vld [vmem:[%s1828_s1 + $0x300] ss:$8 sps:$4 sm:$0xff]   ;;  %v1290_v11 = vld [vmem:[%s1828_s1 + $0x314] ss:$8 sps:$4 sm:$0xff]   ;;  %v1288_v13 = vld [vmem:[%s1828_s1 + $0x310] ss:$8 sps:$4 sm:$0xff]  }
  0x1a   :  { %v1293_v14 = vld [vmem:[%s1828_s1 + $0x124] ss:$8 sps:$4 sm:$0xff]   ;;  %v1291_v16 = vld [vmem:[%s1828_s1 + $0x120] ss:$8 sps:$4 sm:$0xff]   ;;  %v1299_v18 = vld [vmem:[%s1828_s1 + $0x134] ss:$8 sps:$4 sm:$0xff]  }
  0x1b   :  { %843 = vmatpush1.bf16.msra.mxu1 %v1219_v26  ;;  %v1296_v15 = vld [vmem:[%s1828_s1 + $0x324] ss:$8 sps:$4 sm:$0xff]   ;;  %v1294_v17 = vld [vmem:[%s1828_s1 + $0x320] ss:$8 sps:$4 sm:$0xff]   ;;  %v1302_v19 = vld [vmem:[%s1828_s1 + $0x334] ss:$8 sps:$4 sm:$0xff]  }
  0x1c   :  { %925 = vmatpush1.bf16.msra.mxu0 %v1220_v27  ;;  %844 = vmatprep.subr.bf16.mxu1 %v1221_v28  ;;  %v1297_v20 = vld [vmem:[%s1828_s1 + $0x130] ss:$8 sps:$4 sm:$0xff]   ;;  %v1305_v22 = vld [vmem:[%s1828_s1 + $0x144] ss:$8 sps:$4 sm:$0xff]   ;;  %v1303_v24 = vld [vmem:[%s1828_s1 + $0x140] ss:$8 sps:$4 sm:$0xff]  }
  0x1d   :  { %926 = vmatprep.subr.bf16.mxu0 %v1223_v29  ;;  %v1300_v21 = vld [vmem:[%s1828_s1 + $0x330] ss:$8 sps:$4 sm:$0xff]   ;;  %v1308_v23 = vld [vmem:[%s1828_s1 + $0x344] ss:$8 sps:$4 sm:$0xff]   ;;  %v1306_v25 = vld [vmem:[%s1828_s1 + $0x340] ss:$8 sps:$4 sm:$0xff]  }
  0x1e   :  { %v1311_v26 = vld [vmem:[%s1828_s1 + $0x154] ss:$8 sps:$4 sm:$0xff]   ;;  %v1309_v28 = vld [vmem:[%s1828_s1 + $0x150] ss:$8 sps:$4 sm:$0xff]   ;;  %v1341_v50 = vld [vmem:[%s1828_s1 + $0x1a4] ss:$8 sps:$4 sm:$0xff]  }
  0x1f   :  { %845 = vmatpush1.bf16.msra.mxu1 %v1225_v30  ;;  %v1314_v27 = vld [vmem:[%s1828_s1 + $0x354] ss:$8 sps:$4 sm:$0xff]   ;;  %v1312_v29 = vld [vmem:[%s1828_s1 + $0x350] ss:$8 sps:$4 sm:$0xff]   ;;  %v1317_v30 = vld [vmem:[%s1828_s1 + $0x164] ss:$8 sps:$4 sm:$0xff]  }
  0x20   :  { %927 = vmatpush1.bf16.msra.mxu0 %v1226_v31  ;;  %846 = vmatprep.subr.bf16.mxu1 %v1227_v32  ;;  %v1320_v31 = vld [vmem:[%s1828_s1 + $0x364] ss:$8 sps:$4 sm:$0xff]   ;;  %v1335_v46 = vld [vmem:[%s1828_s1 + $0x194] ss:$8 sps:$4 sm:$0xff]   ;;  %v1333_v48 = vld [vmem:[%s1828_s1 + $0x190] ss:$8 sps:$4 sm:$0xff]  }
  0x21   :  { %928 = vmatprep.subr.bf16.mxu0 %v1229_v33  ;;  %v1687_v32 = vld [vmem:[%s1829_s0 + $0x8] sm:$0xff]  ;;  %v1692_v33 = vld [vmem:[%s1829_s0 + $0x18] sm:$0xff] }
  0x22   :  { %v1342_v53 = vld [vmem:[%s1828_s1 + $0x3a0] ss:$8 sps:$4 sm:$0xff]  }
  0x23   :  { %847 = vmatpush1.bf16.msra.mxu1 %v1231_v34  ;;  %v1032_v34 = vcombine.high %v1687_v32, %v1687_v32 }
  0x24   :  { %929 = vmatpush1.bf16.msra.mxu0 %v1232_v35  ;;  %848 = vmatprep.subr.bf16.mxu1 %v1233_v36  ;;  %v1036_v35 = vcombine.high %v1692_v33, %v1692_v33  ;;  %v1315_v36 = vld [vmem:[%s1828_s1 + $0x160] ss:$8 sps:$4 sm:$0xff]  }
  0x25   :  { %930 = vmatprep.subr.bf16.mxu0 %v1235_v37  ;;  %v1318_v37 = vld [vmem:[%s1828_s1 + $0x360] ss:$8 sps:$4 sm:$0xff]  }
  0x27   :  { %849 = vmatpush1.bf16.msra.mxu1 %v1237_v38  ;;  %v1323_v38 = vld [vmem:[%s1828_s1 + $0x174] ss:$8 sps:$4 sm:$0xff]  }
  0x28   :  { %931 = vmatpush1.bf16.msra.mxu0 %v1238_v39  ;;  %850 = vmatprep.subr.bf16.mxu1 %v1239_v40  ;;  %v1326_v39 = vld [vmem:[%s1828_s1 + $0x374] ss:$8 sps:$4 sm:$0xff]   ;;  %v1321_v40 = vld [vmem:[%s1828_s1 + $0x170] ss:$8 sps:$4 sm:$0xff]  }
  0x29   :  { %932 = vmatprep.subr.bf16.mxu0 %v1241_v41  ;;  %v1324_v41 = vld [vmem:[%s1828_s1 + $0x370] ss:$8 sps:$4 sm:$0xff]  }
  0x2b   :  { %851 = vmatpush1.bf16.msra.mxu1 %v1243_v42  ;;  %v1329_v42 = vld [vmem:[%s1828_s1 + $0x184] ss:$8 sps:$4 sm:$0xff]  }
  0x2c   :  { %933 = vmatpush1.bf16.msra.mxu0 %v1244_v43  ;;  %852 = vmatprep.subr.bf16.mxu1 %v1245_v44  ;;  %v1332_v43 = vld [vmem:[%s1828_s1 + $0x384] ss:$8 sps:$4 sm:$0xff]   ;;  %v1327_v44 = vld [vmem:[%s1828_s1 + $0x180] ss:$8 sps:$4 sm:$0xff]  }
  0x2d   :  { %934 = vmatprep.subr.bf16.mxu0 %v1247_v45  ;;  %v1330_v45 = vld [vmem:[%s1828_s1 + $0x380] ss:$8 sps:$4 sm:$0xff]  }
  0x2f   :  { %853 = vmatpush1.bf16.msra.mxu1 %v1249_v47  ;;  %v1338_v47 = vld [vmem:[%s1828_s1 + $0x394] ss:$8 sps:$4 sm:$0xff]  }
  0x30   :  { %935 = vmatpush1.bf16.msra.mxu0 %v1250_v49  ;;  %854 = vmatprep.subr.bf16.mxu1 %v1251_v51  ;;  %v1336_v49 = vld [vmem:[%s1828_s1 + $0x390] ss:$8 sps:$4 sm:$0xff]   ;;  %v1344_v51 = vld [vmem:[%s1828_s1 + $0x3a4] ss:$8 sps:$4 sm:$0xff]  }
  0x31   :  { %936 = vmatprep.subr.bf16.mxu0 %v1253_v52  ;;  %v1339_v52 = vld [vmem:[%s1828_s1 + $0x1a0] ss:$8 sps:$4 sm:$0xff]  }
  0x33   :  { %855 = vmatpush1.bf16.msra.mxu1 %v1255_v54  ;;  %v1347_v54 = vld [vmem:[%s1828_s1 + $0x1b4] ss:$8 sps:$4 sm:$0xff]  }
  0x34   :  { %937 = vmatpush1.bf16.msra.mxu0 %v1256_v55  ;;  %856 = vmatprep.subr.bf16.mxu1 %v1257_v56  ;;  %v1350_v55 = vld [vmem:[%s1828_s1 + $0x3b4] ss:$8 sps:$4 sm:$0xff]   ;;  %v1345_v56 = vld [vmem:[%s1828_s1 + $0x1b0] ss:$8 sps:$4 sm:$0xff]  }
  0x35   :  { %938 = vmatprep.subr.bf16.mxu0 %v1259_v57  ;;  %v1348_v57 = vld [vmem:[%s1828_s1 + $0x3b0] ss:$8 sps:$4 sm:$0xff]  }
  0x37   :  { %857 = vmatpush1.bf16.msra.mxu1 %v1261_v58  ;;  %v1353_v58 = vld [vmem:[%s1828_s1 + $0x1c4] ss:$8 sps:$4 sm:$0xff]  }
  0x38   :  { %939 = vmatpush1.bf16.msra.mxu0 %v1262_v59  ;;  %858 = vmatprep.subr.bf16.mxu1 %v1263_v60  ;;  %v1356_v59 = vld [vmem:[%s1828_s1 + $0x3c4] ss:$8 sps:$4 sm:$0xff]   ;;  %v1351_v60 = vld [vmem:[%s1828_s1 + $0x1c0] ss:$8 sps:$4 sm:$0xff]  }
  0x39   :  { %940 = vmatprep.subr.bf16.mxu0 %v1265_v61  ;;  %v1354_v61 = vld [vmem:[%s1828_s1 + $0x3c0] ss:$8 sps:$4 sm:$0xff]  }
  0x3b   :  { %859 = vmatpush1.bf16.msra.mxu1 %v1267_v62  ;;  %v1359_v62 = vld [vmem:[%s1828_s1 + $0x1d4] ss:$8 sps:$4 sm:$0xff]  }
  0x3c   :  { %941 = vmatpush1.bf16.msra.mxu0 %v1268_v63  ;;  %860 = vmatprep.subr.bf16.mxu1 %v1269_v0  ;;  %v1362_v63 = vld [vmem:[%s1828_s1 + $0x3d4] ss:$8 sps:$4 sm:$0xff]   ;;  %v1357_v0 = vld [vmem:[%s1828_s1 + $0x1d0] ss:$8 sps:$4 sm:$0xff]  }
  0x3d   :  { %942 = vmatprep.subr.bf16.mxu0 %v1271_v1  ;;  %v1360_v1 = vld [vmem:[%s1828_s1 + $0x3d0] ss:$8 sps:$4 sm:$0xff]  }
  0x3f   :  { %861 = vmatpush1.bf16.msra.mxu1 %v1273_v2  ;;  %v1365_v2 = vld [vmem:[%s1828_s1 + $0x1e4] ss:$8 sps:$4 sm:$0xff]  }
  0x40   :  { %943 = vmatpush1.bf16.msra.mxu0 %v1274_v3  ;;  %871 = vmatprep.subr.bf16.mxu1 %v1279_v4  ;;  %v1368_v3 = vld [vmem:[%s1828_s1 + $0x3e4] ss:$8 sps:$4 sm:$0xff]   ;;  %v1363_v4 = vld [vmem:[%s1828_s1 + $0x1e0] ss:$8 sps:$4 sm:$0xff]  }
  0x41   :  { %953 = vmatprep.subr.bf16.mxu0 %v1284_v5  ;;  %v1366_v5 = vld [vmem:[%s1828_s1 + $0x3e0] ss:$8 sps:$4 sm:$0xff]  }
  0x42   :  { %863 = vmatmul.mubr.bf16.vlgmr.msra.gmra.mrb[0].mxu1 %v1029_v6  ;;  %v1371_v6 = vld [vmem:[%s1828_s1 + $0x1f4] ss:$8 sps:$4 sm:$0xff]  }
  0x43   :  { %945 = vmatmul.mubr.bf16.vlgmr.msra.gmra.mrb[0].mxu0 %v1033_v7  ;;  %872 = vmatpush1.bf16.msra.mxu1 %v1277_v8  ;;  %v1374_v7 = vld [vmem:[%s1828_s1 + $0x3f4] ss:$8 sps:$4 sm:$0xff]   ;;  %v1369_v8 = vld [vmem:[%s1828_s1 + $0x1f0] ss:$8 sps:$4 sm:$0xff]  }
  0x44   :  { %954 = vmatpush1.bf16.msra.mxu0 %v1282_v9  ;;  %873 = vmatprep.subr.bf16.mxu1 %v1287_v10  ;;  %v1372_v9 = vld [vmem:[%s1828_s1 + $0x3f0] ss:$8 sps:$4 sm:$0xff]   ;;  %v1031_v10 = vcombine.low %v1687_v32, %v1687_v32 }
  0x45   :  { %955 = vmatprep.subr.bf16.mxu0 %v1290_v11  ;;  %903 = vmatprep.mubr.bf16.mxu1 %v1032_v34  ;;  %v1035_v11 = vcombine.low %v1692_v33, %v1692_v33 }
  0x46   :  { %985 = vmatprep.mubr.bf16.mxu0 %v1036_v35 }
  0x47   :  { %874 = vmatpush1.bf16.msra.mxu1 %v1285_v12  ;;  %v152_v12 = vlaneseq }
  0x48   :  { %956 = vmatpush1.bf16.msra.mxu0 %v1288_v13  ;;  %875 = vmatprep.subr.bf16.mxu1 %v1293_v14 }
  0x49   :  { %957 = vmatprep.subr.bf16.mxu0 %v1296_v15  ;;  %v153_v13 = vshrl.u32 %v152_v12, 7  ;;  %v150_v15 = vld [vmem:[%s1830_s2] ss:$2 sm:$0x3] }
  0x4b   :  { %876 = vmatpush1.bf16.msra.mxu1 %v1291_v16  ;;  %v154_v14 = vsub.s32 0, %v153_v13  ;;  %v158_v16 = vsub.s32 1, %v153_v13 }
  0x4c   :  { %958 = vmatpush1.bf16.msra.mxu0 %v1294_v17  ;;  %877 = vmatprep.subr.bf16.mxu1 %v1299_v18 }
  0x4d   :  { %959 = vmatprep.subr.bf16.mxu0 %v1302_v19  ;;  %v155_v17 = vrot.slane %v150_v15, %v154_v14  ;;  %v159_v18 = vrot.slane %v150_v15, %v158_v16 }
  0x4f   :  { %878 = vmatpush1.bf16.msra.mxu1 %v1297_v20 }
  0x50   :  { %960 = vmatpush1.bf16.msra.mxu0 %v1300_v21  ;;  %879 = vmatprep.subr.bf16.mxu1 %v1305_v22  ;;  %v1165_v21 = vld [vmem:[%s1830_s2 + $0x1] ss:$2 sm:$0x3] }
  0x51   :  { %961 = vmatprep.subr.bf16.mxu0 %v1308_v23  ;;  %v1006_v33 = vrot.slane %v1165_v21, %v158_v16 }
  0x53   :  { %880 = vmatpush1.bf16.msra.mxu1 %v1303_v24 }
  0x54   :  { %962 = vmatpush1.bf16.msra.mxu0 %v1306_v25  ;;  %881 = vmatprep.subr.bf16.mxu1 %v1311_v26 }
  0x55   :  { %963 = vmatprep.subr.bf16.mxu0 %v1314_v27 }
  0x57   :  { %882 = vmatpush1.bf16.msra.mxu1 %v1309_v28 }
  0x58   :  { %964 = vmatpush1.bf16.msra.mxu0 %v1312_v29  ;;  %883 = vmatprep.subr.bf16.mxu1 %v1317_v30 }
  0x59   :  { %965 = vmatprep.subr.bf16.mxu0 %v1320_v31  ;;  %v1002_v31 = vrot.slane %v1165_v21, %v154_v14 }
  0x5b   :  { %884 = vmatpush1.bf16.msra.mxu1 %v1315_v36 }
  0x5c   :  { %966 = vmatpush1.bf16.msra.mxu0 %v1318_v37  ;;  %885 = vmatprep.subr.bf16.mxu1 %v1323_v38 }
  0x5d   :  { %967 = vmatprep.subr.bf16.mxu0 %v1326_v39  ;;  %v1015_v39 = vstv %s1831_s3 }
  0x5f   :  { %886 = vmatpush1.bf16.msra.mxu1 %v1321_v40 }
  0x60   :  { %968 = vmatpush1.bf16.msra.mxu0 %v1324_v41  ;;  %887 = vmatprep.subr.bf16.mxu1 %v1329_v42 }
  0x61   :  { %969 = vmatprep.subr.bf16.mxu0 %v1332_v43 }
  0x63   :  { %888 = vmatpush1.bf16.msra.mxu1 %v1327_v44 }
  0x64   :  { %970 = vmatpush1.bf16.msra.mxu0 %v1330_v45  ;;  %889 = vmatprep.subr.bf16.mxu1 %v1335_v46 }
  0x65   :  { %971 = vmatprep.subr.bf16.mxu0 %v1338_v47 }
  0x67   :  { %890 = vmatpush1.bf16.msra.mxu1 %v1333_v48 }
  0x68   :  { %972 = vmatpush1.bf16.msra.mxu0 %v1336_v49  ;;  %891 = vmatprep.subr.bf16.mxu1 %v1341_v50 }
  0x69   :  { %973 = vmatprep.subr.bf16.mxu0 %v1344_v51 }
  0x6b   :  { %892 = vmatpush1.bf16.msra.mxu1 %v1339_v52 }
  0x6c   :  { %974 = vmatpush1.bf16.msra.mxu0 %v1342_v53  ;;  %893 = vmatprep.subr.bf16.mxu1 %v1347_v54 }
  0x6d   :  { %975 = vmatprep.subr.bf16.mxu0 %v1350_v55 }
  0x6f   :  { %894 = vmatpush1.bf16.msra.mxu1 %v1345_v56 }
  0x70   :  { %976 = vmatpush1.bf16.msra.mxu0 %v1348_v57  ;;  %895 = vmatprep.subr.bf16.mxu1 %v1353_v58 }
  0x71   :  { %977 = vmatprep.subr.bf16.mxu0 %v1356_v59 }
  0x73   :  { %896 = vmatpush1.bf16.msra.mxu1 %v1351_v60 }
  0x74   :  { %978 = vmatpush1.bf16.msra.mxu0 %v1354_v61  ;;  %897 = vmatprep.subr.bf16.mxu1 %v1359_v62 }
  0x75   :  { %979 = vmatprep.subr.bf16.mxu0 %v1362_v63 }
  0x77   :  { %898 = vmatpush1.bf16.msra.mxu1 %v1357_v0 }
  0x78   :  { %980 = vmatpush1.bf16.msra.mxu0 %v1360_v1  ;;  %899 = vmatprep.subr.bf16.mxu1 %v1365_v2 }
  0x79   :  { %981 = vmatprep.subr.bf16.mxu0 %v1368_v3 }
  0x7b   :  { %900 = vmatpush1.bf16.msra.mxu1 %v1363_v4 }
  0x7c   :  { %982 = vmatpush1.bf16.msra.mxu0 %v1366_v5  ;;  %901 = vmatprep.subr.bf16.mxu1 %v1371_v6 }
  0x7d   :  { %983 = vmatprep.subr.bf16.mxu0 %v1374_v7 }
  0x7f   :  { %902 = vmatpush1.bf16.msra.mxu1 %v1369_v8 }
  0x80   :  { %984 = vmatpush1.bf16.msra.mxu0 %v1372_v9 }
  0x82   :  { %904 = vmatmul.mubr.bf16.vlgmr.msra.gmra.mrb[0].mxu1 %v1031_v10 }
  0x83   :  { %986 = vmatmul.mubr.bf16.vlgmr.msra.gmra.mrb[0].mxu0 %v1035_v11 }
 0x155   :  { %v905_v19 = vpop.f32.mrb[0].mxu1 }
 0x156   :  { %v987_v20 = vpop.f32.mrb[0].mxu0  ;;  %v1167_v22 = vadd.f32 %v905_v19, %v155_v17  ;;  %v907_v23 = vpop.f32.mrb[1].mxu1 }
 0x157   :  { %v989_v24 = vpop.f32.mrb[1].mxu0  ;;  %v1169_v25 = vadd.f32 %v907_v23, %v159_v18  ;;  %v909_v26 = vpop.f32.mrb[2].mxu1 }
 0x158   :  { %v991_v27 = vpop.f32.mrb[2].mxu0  ;;  %v1168_v28 = vadd.f32 %v1167_v22, %v987_v20  ;;  %v910_v29 = vpop.f32.mrb[3].mxu1 }
 0x159   :  { %v992_v30 = vpop.f32.mrb[3].mxu0  ;;  %v1170_v32 = vadd.f32 %v1169_v25, %v989_v24 }
 0x15a   :  { %v994_v34 = vmax.f32 %v1168_v28, 0.0 }
 0x15b   :  { %v995_v35 = vmax.f32 %v1170_v32, 0.0 }
 0x15c   :  { %v1009_v36 = vmul.f32 %v1002_v31, %v994_v34 }
 0x15d   :  { %v1010_v37 = vmul.f32 %v1006_v33, %v995_v35 }
 0x15f   :  { %v1011_v38 = vadd.f32 %v1010_v37, %v1009_v36 }
 0x161   :  { %1012 = vadd.xlane.f32.xlu0 %v1011_v38 }
 0x1ee   :  { %v1013_v40 = vpop.xlane.xlu0 %1012 }
 0x1ef   :  { %v1016_v41 = vadd.f32 %v1015_v39, %v1013_v40 }
 0x1f1   :  { %v1166_v42 = vmul.f32 -1.442695, %v1016_v41 }
 0x1f3   :  { %1379 = vpow2.f32 %v1166_v42 }
 0x1fd   :  { %v1380_v43 = vpop.eup %1379 }
 0x1fe   :  { %v1020_v44 = vadd.f32 1.0, %v1380_v43 }
 0x200   :  { %1381 = vrcp.f32 %v1020_v44 }
 0x20a   :  { %v1382_v45 = vpop.eup %1381 }
 0x20b   :  { %1024 = vst.msk [vmem:[%s1832_s4] sm:$0xff] %vm1023_vm0, %v1382_v45 }

</bundles_post_ra>
